<compile_context>
chip_gen: v5e
topology: v5e:2x2
jax: 0.10.0
libtpu: 0.0.40
codegen_flags: <defaults>
</compile_context>

<pallas_src>
import functools

import jax
import jax.numpy as jnp
from jax import lax
from jax.experimental import pallas as pl
from jax.experimental.pallas import tpu as pltpu


def rnn_kernel(x_ref, wih0_ref, whh0_ref, *rest, num_layers):
    # x_ref    : (S*BT, D)      bf16  time-major rows of this batch tile (row = t*BT + b)
    # wih0_ref : (D, H)         bf16  layer-0 W_ih^T
    # whh0_ref : (H, H)         bf16  layer-0 W_hh^T
    # [wihr_ref: (L-1, H, H)    bf16  layers>=1 W_ih^T ]   only present if L > 1
    # [whhr_ref: (L-1, H, H)    bf16  layers>=1 W_hh^T ]   only present if L > 1
    # b_ref    : (L, H)         f32   combined biases b_ih + b_hh
    # wfc_ref  : (H, Opad)      bf16  fc W^T, lane-padded
    # bfc_ref  : (1, Opad)      f32   fc bias, lane-padded
    # out_ref  : (BT, Opad)     f32
    # xh_scr   : (S*BT, H)      f32   hoisted layer-0 input projection
    L = num_layers
    if L > 1:
        wihr_ref, whhr_ref = rest[0], rest[1]
        rest = rest[2:]
    b_ref, wfc_ref, bfc_ref, out_ref, xh_scr = rest

    SB = x_ref.shape[0]
    H = whh0_ref.shape[0]
    BT = out_ref.shape[0]
    S = SB // BT

    # (1) Hoist the time-invariant layer-0 input projection out of the
    #     recurrence: ONE (S*BT, D) @ (D, H) MXU matmul (bf16 in, f32 acc)
    #     with the layer-0 combined bias folded in.
    # TODO(synk): at production S, keep x in HBM (memory_space=pl.ANY) and
    # stream S-chunks of this projection through a small double-buffered
    # scratch instead of one resident (S*BT, H) buffer (v7x VMEM is 64 MiB).
    xh_scr[...] = (
        jnp.dot(x_ref[...], wih0_ref[...], preferred_element_type=jnp.float32)
        + b_ref[0:1, :])

    # (2) Hoist only the small (1, H) bias vectors; weights stay as loop-
    #     invariant VMEM ref reads at the dot site.
    biases = [b_ref[l:l + 1, :] for l in range(1, L)]

    # (3) Recurrence: hidden state carried in the fori_loop carry (vregs) —
    #     no VMEM store/load round-trip on the serial critical path.
    h_init = tuple(jnp.zeros((BT, H), jnp.float32) for _ in range(L))

    def step(t, hs):
        row = pl.multiple_of(t * BT, 8)          # BT is a multiple of 8
        x_t = xh_scr[pl.ds(row, BT), :]          # (BT, H), layer-0 bias included
        # layer 0: only h @ W_hh^T remains on the serial critical path
        h0 = jnp.maximum(
            x_t + jnp.dot(hs[0].astype(jnp.bfloat16), whh0_ref[...],
                          preferred_element_type=jnp.float32),
            0.0)
        new_hs = [h0]
        inp = h0
        # layers >= 1: two independent MXU pushes summed in f32 — no per-step
        # lane concat on the critical path.
        for l in range(1, L):                    # static Python layer loop
            pre = (jnp.dot(inp.astype(jnp.bfloat16), wihr_ref[l - 1],
                           preferred_element_type=jnp.float32)
                   + jnp.dot(hs[l].astype(jnp.bfloat16), whhr_ref[l - 1],
                             preferred_element_type=jnp.float32)
                   + biases[l - 1])
            h_l = jnp.maximum(pre, 0.0)
            new_hs.append(h_l)
            inp = h_l
        return tuple(new_hs)

    # Full unroll for short sequences; partial unroll (8) for long ones so the
    # scheduler still sees enough work to overlap the tiny serial matmuls.
    # TODO(synk): wavefront-schedule layers across timesteps (layer l of step t
    # together with layer l-1 of step t+1) to keep L MXU pushes in flight.
    hs = lax.fori_loop(0, S, step, h_init, unroll=S if S <= 16 else 8)

    # (4) fc on the last timestep of the top layer; (BT, Opad) is a fully
    #     sublane/lane-dense tile -> unmasked stores.
    out_ref[...] = (
        jnp.dot(hs[L - 1].astype(jnp.bfloat16), wfc_ref[...],
                preferred_element_type=jnp.float32)
        + bfc_ref[...])


def rnn_forward(x, params):
    """x: (batch, seq, input_dim) f32, batch_first like the PyTorch module."""
    wih0_t, wihr_t, whh_t, bih, bhh, wfc_t, bfc = params
    B, S, D = x.shape
    L, H, _ = whh_t.shape
    O = wfc_t.shape[1]

    # Batch tile: cap at 256 rows (MXU height on v6e/v7x; 128 already fills
    # v5e); at toy batch just pad to a sublane-dense multiple of 8.
    if B > 256:
        BT = 256
        B_PAD = pl.cdiv(B, BT) * BT
    else:
        B_PAD = ((B + 7) // 8) * 8
        BT = B_PAD
    n_bt = B_PAD // BT
    O_PAD = max(128, ((O + 127) // 128) * 128)       # lane-dense fc output

    bf16 = lambda a: a.astype(jnp.bfloat16)

    # time-major, batch padded, grouped per batch tile, bf16:
    #   (B,S,D) -> (S,Bp,D) -> (n_bt, S*BT, D) with row = t*BT + b inside a tile.
    # Padded rows are junk computed independently per batch row, never read back.
    x_tm = jnp.transpose(x, (1, 0, 2))                              # (S, B, D)
    x_tm = jnp.pad(x_tm, ((0, 0), (0, B_PAD - B), (0, 0)))          # (S, Bp, D)
    x_blk = bf16(x_tm.reshape(S, n_bt, BT, D)
                     .transpose(1, 0, 2, 3)
                     .reshape(n_bt, S * BT, D))                     # (n_bt, S*BT, D)

    b = bih + bhh                                                   # (L, H)

    # lane-pad fc weights / bias (zero columns don't change the first O outputs).
    wfc_pad = jnp.zeros((H, O_PAD), jnp.float32).at[:, :O].set(wfc_t)
    bfc_pad = jnp.zeros((1, O_PAD), jnp.float32).at[:, :O].set(bfc)

    full = lambda shape: pl.BlockSpec(shape, lambda i, n=len(shape): (0,) * n)

    in_specs = [
        # batch-tile block of x; leading (tile) dim squeezed out of the kernel ref
        pl.BlockSpec((None, S * BT, D), lambda i: (i, 0, 0)),
        full((D, H)),                                   # wih0^T
        full((H, H)),                                   # whh0^T
    ]
    args = [x_blk, bf16(wih0_t), bf16(whh_t[0])]
    if L > 1:                                           # no dummy weights when L == 1
        in_specs += [full((L - 1, H, H)), full((L - 1, H, H))]
        args += [bf16(wihr_t), bf16(whh_t[1:])]
    in_specs += [full((L, H)), full((H, O_PAD)), full((1, O_PAD))]
    args += [b, bf16(wfc_pad), bfc_pad]

    # NOTE: at production S one would also set vmem_limit_bytes with an explicit
    # budget (x chunk + xh chunk + weights + out, double-buffered) and keep x in
    # HBM with chunked DMA — at these toy shapes everything fits comfortably.
    out_pad = pl.pallas_call(
        functools.partial(rnn_kernel, num_layers=L),
        out_shape=jax.ShapeDtypeStruct((B_PAD, O_PAD), jnp.float32),
        grid=(n_bt,),                                   # batch tiles across TCs (v7x)
        in_specs=in_specs,
        out_specs=pl.BlockSpec((BT, O_PAD), lambda i: (i, 0)),
        scratch_shapes=[pltpu.VMEM((S * BT, H), jnp.float32)],
        compiler_params=pltpu.CompilerParams(
            dimension_semantics=("parallel",)),
    )(*args)
    return out_pad[:B, :O]


def rnn_reference(x, params):
    """Pure-JAX reference of the stacked ReLU RNN + Linear (PyTorch semantics),
    mirroring the kernel's bf16-weight / f32-accumulation numerics."""
    wih0_t, wihr_t, whh_t, bih, bhh, wfc_t, bfc = params
    B, S, D = x.shape
    L, H, _ = whh_t.shape

    def bdot(a, w):
        return jnp.dot(a.astype(jnp.bfloat16), w.astype(jnp.bfloat16),
                       preferred_element_type=jnp.float32)

    h = [jnp.zeros((B, H), jnp.float32) for _ in range(L)]
    for t in range(S):
        inp = x[:, t, :]
        for l in range(L):
            wih = wih0_t if l == 0 else wihr_t[l - 1]
            pre = bdot(inp, wih) + bih[l] + bdot(h[l], whh_t[l]) + bhh[l]
            h[l] = jnp.maximum(pre, 0.0)
            inp = h[l]
    return bdot(h[-1], wfc_t) + bfc


if __name__ == "__main__":
    # Small shapes consistent with the module: input_dim=16, hidden_dim=32,
    # layer_dim=2, output_dim=10, batch=2, seq=8.
    B, S, D, H, L, O = 2, 8, 16, 32, 2, 10

    key = jax.random.PRNGKey(0)
    keys = jax.random.split(key, 8)
    bound = 1.0 / jnp.sqrt(jnp.float32(H))   # PyTorch-style uniform init bound

    def u(k, shape, bnd):
        return jax.random.uniform(k, shape, jnp.float32, -bnd, bnd)

    x = jax.random.normal(keys[0], (B, S, D), jnp.float32)

    wih0_t = u(keys[1], (D, H), bound)         # layer 0 W_ih^T
    wihr_t = u(keys[2], (L - 1, H, H), bound)  # layers>=1 W_ih^T
    whh_t = u(keys[3], (L, H, H), bound)       # W_hh^T per layer
    bih = u(keys[4], (L, H), bound)
    bhh = u(keys[5], (L, H), bound)
    wfc_t = u(keys[6], (H, O), bound)          # fc W^T
    bfc = u(keys[7], (1, O), bound)

    params = (wih0_t, wihr_t, whh_t, bih, bhh, wfc_t, bfc)

    out = jax.block_until_ready(rnn_forward(x, params))
    ref = rnn_reference(x, params)

    assert out.shape == (B, O)
    assert jnp.allclose(out, ref, atol=2e-3, rtol=2e-3), "mismatch vs reference"

    print("KERNEL_OK")
</pallas_src>

<mosaic_0001>
module attributes {stable_mosaic.version = 11 : i64} {
  func.func @rnn_kernel(%arg0: i32, %arg1: memref<1x64x16xbf16, #tpu.memory_space<vmem>>, %arg2: memref<16x32xbf16, #tpu.memory_space<vmem>>, %arg3: memref<32x32xbf16, #tpu.memory_space<vmem>>, %arg4: memref<1x32x32xbf16, #tpu.memory_space<vmem>>, %arg5: memref<1x32x32xbf16, #tpu.memory_space<vmem>>, %arg6: memref<2x32xf32, #tpu.memory_space<vmem>>, %arg7: memref<32x128xbf16, #tpu.memory_space<vmem>>, %arg8: memref<1x128xf32, #tpu.memory_space<vmem>>, %arg9: memref<8x128xf32, #tpu.memory_space<vmem>>, %arg10: memref<64x32xf32, #tpu.memory_space<vmem>>) attributes {dimension_semantics = [#tpu.dimension_semantics<parallel>], iteration_bounds = array<i64: 1>, scalar_prefetch = 0 : i64, scratch_operands = 1 : i64, tpu.core_type = #tpu.core_type<tc>, window_params = [{transform_indices = @transform_0, window_bounds = array<i64: 1, 64, 16>}, {pipeline_mode = #tpu.pipeline_mode<synchronous>, transform_indices = @transform_1, window_bounds = array<i64: 16, 32>}, {pipeline_mode = #tpu.pipeline_mode<synchronous>, transform_indices = @transform_2, window_bounds = array<i64: 32, 32>}, {pipeline_mode = #tpu.pipeline_mode<synchronous>, transform_indices = @transform_3, window_bounds = array<i64: 1, 32, 32>}, {pipeline_mode = #tpu.pipeline_mode<synchronous>, transform_indices = @transform_4, window_bounds = array<i64: 1, 32, 32>}, {pipeline_mode = #tpu.pipeline_mode<synchronous>, transform_indices = @transform_5, window_bounds = array<i64: 2, 32>}, {pipeline_mode = #tpu.pipeline_mode<synchronous>, transform_indices = @transform_6, window_bounds = array<i64: 32, 128>}, {pipeline_mode = #tpu.pipeline_mode<synchronous>, transform_indices = @transform_7, window_bounds = array<i64: 1, 128>}, {transform_indices = @transform_8, window_bounds = array<i64: 8, 128>}]} {
    %c0 = arith.constant 0 : index
    %c0_0 = arith.constant 0 : index
    %c0_1 = arith.constant 0 : index
    %0 = vector.load %arg1[%c0, %c0_0, %c0_1] : memref<1x64x16xbf16, #tpu.memory_space<vmem>>, vector<1x64x16xbf16>
    %1 = vector.shape_cast %0 : vector<1x64x16xbf16> to vector<64x16xbf16>
    %c0_2 = arith.constant 0 : index
    %c0_3 = arith.constant 0 : index
    %2 = vector.load %arg2[%c0_2, %c0_3] : memref<16x32xbf16, #tpu.memory_space<vmem>>, vector<16x32xbf16>
    %cst = arith.constant dense<0.000000e+00> : vector<64x32xf32>
    %3 = tpu.matmul %1, %2, %cst {dimension_numbers = #tpu.dot_dimension_numbers<[1], [0], [0], [1], [0, 0, 1, 1], [], []>} : vector<64x16xbf16>, vector<16x32xbf16>, vector<64x32xf32> -> vector<64x32xf32>
    %c0_4 = arith.constant 0 : index
    %c0_5 = arith.constant 0 : index
    %4 = vector.load %arg6[%c0_4, %c0_5] : memref<2x32xf32, #tpu.memory_space<vmem>>, vector<1x32xf32>
    %5 = vector.broadcast %4 : vector<1x32xf32> to vector<64x32xf32>
    %6 = arith.addf %3, %5 : vector<64x32xf32>
    %c0_6 = arith.constant 0 : index
    %c0_7 = arith.constant 0 : index
    %7 = vector.load %arg10[%c0_6, %c0_7] : memref<64x32xf32, #tpu.memory_space<vmem>>, vector<64x32xf32>
    tpu.vector_store %arg10[%c0_6, %c0_7], %6 {strides = array<i32>} : memref<64x32xf32, #tpu.memory_space<vmem>>, vector<64x32xf32>,
    %c1 = arith.constant 1 : index
    %c0_8 = arith.constant 0 : index
    %8 = vector.load %arg6[%c1, %c0_8] : memref<2x32xf32, #tpu.memory_space<vmem>>, vector<1x32xf32>
    %cst_9 = arith.constant 0.000000e+00 : f32
    %9 = vector.broadcast %cst_9 : f32 to vector<8x32xf32>
    %cst_10 = arith.constant 0.000000e+00 : f32
    %10 = vector.broadcast %cst_10 : f32 to vector<8x32xf32>
    %c0_i32 = arith.constant 0 : i32
    %c8_i32 = arith.constant 8 : i32
    %11 = arith.muli %c0_i32, %c8_i32 : i32
    %12 = tpu.assume_multiple %11, 8 : i32
    %13 = arith.index_cast %12 : i32 to index
    %c0_11 = arith.constant 0 : index
    %14 = vector.load %arg10[%13, %c0_11] : memref<64x32xf32, #tpu.memory_space<vmem>>, vector<8x32xf32>
    %15 = arith.truncf %9 : vector<8x32xf32> to vector<8x32xbf16>
    %c0_12 = arith.constant 0 : index
    %c0_13 = arith.constant 0 : index
    %16 = vector.load %arg3[%c0_12, %c0_13] : memref<32x32xbf16, #tpu.memory_space<vmem>>, vector<32x32xbf16>
    %cst_14 = arith.constant dense<0.000000e+00> : vector<8x32xf32>
    %17 = tpu.matmul %15, %16, %cst_14 {dimension_numbers = #tpu.dot_dimension_numbers<[1], [0], [0], [1], [0, 0, 1, 1], [], []>} : vector<8x32xbf16>, vector<32x32xbf16>, vector<8x32xf32> -> vector<8x32xf32>
    %18 = arith.addf %14, %17 : vector<8x32xf32>
    %cst_15 = arith.constant 0.000000e+00 : f32
    %19 = vector.broadcast %cst_15 : f32 to vector<8x32xf32>
    %20 = arith.maximumf %18, %19 : vector<8x32xf32>
    %21 = arith.truncf %20 : vector<8x32xf32> to vector<8x32xbf16>
    %c0_16 = arith.constant 0 : index
    %c0_17 = arith.constant 0 : index
    %c0_18 = arith.constant 0 : index
    %22 = vector.load %arg4[%c0_16, %c0_17, %c0_18] : memref<1x32x32xbf16, #tpu.memory_space<vmem>>, vector<1x32x32xbf16>
    %23 = vector.shape_cast %22 : vector<1x32x32xbf16> to vector<32x32xbf16>
    %cst_19 = arith.constant dense<0.000000e+00> : vector<8x32xf32>
    %24 = tpu.matmul %21, %23, %cst_19 {dimension_numbers = #tpu.dot_dimension_numbers<[1], [0], [0], [1], [0, 0, 1, 1], [], []>} : vector<8x32xbf16>, vector<32x32xbf16>, vector<8x32xf32> -> vector<8x32xf32>
    %25 = arith.truncf %10 : vector<8x32xf32> to vector<8x32xbf16>
    %c0_20 = arith.constant 0 : index
    %c0_21 = arith.constant 0 : index
    %c0_22 = arith.constant 0 : index
    %26 = vector.load %arg5[%c0_20, %c0_21, %c0_22] : memref<1x32x32xbf16, #tpu.memory_space<vmem>>, vector<1x32x32xbf16>
    %27 = vector.shape_cast %26 : vector<1x32x32xbf16> to vector<32x32xbf16>
    %cst_23 = arith.constant dense<0.000000e+00> : vector<8x32xf32>
    %28 = tpu.matmul %25, %27, %cst_23 {dimension_numbers = #tpu.dot_dimension_numbers<[1], [0], [0], [1], [0, 0, 1, 1], [], []>} : vector<8x32xbf16>, vector<32x32xbf16>, vector<8x32xf32> -> vector<8x32xf32>
    %29 = arith.addf %24, %28 : vector<8x32xf32>
    %30 = vector.broadcast %8 : vector<1x32xf32> to vector<8x32xf32>
    %31 = arith.addf %29, %30 : vector<8x32xf32>
    %cst_24 = arith.constant 0.000000e+00 : f32
    %32 = vector.broadcast %cst_24 : f32 to vector<8x32xf32>
    %33 = arith.maximumf %31, %32 : vector<8x32xf32>
    %c1_i32 = arith.constant 1 : i32
    %c8_i32_25 = arith.constant 8 : i32
    %34 = arith.muli %c1_i32, %c8_i32_25 : i32
    %35 = tpu.assume_multiple %34, 8 : i32
    %36 = arith.index_cast %35 : i32 to index
    %c0_26 = arith.constant 0 : index
    %37 = vector.load %arg10[%36, %c0_26] : memref<64x32xf32, #tpu.memory_space<vmem>>, vector<8x32xf32>
    %38 = arith.truncf %20 : vector<8x32xf32> to vector<8x32xbf16>
    %c0_27 = arith.constant 0 : index
    %c0_28 = arith.constant 0 : index
    %39 = vector.load %arg3[%c0_27, %c0_28] : memref<32x32xbf16, #tpu.memory_space<vmem>>, vector<32x32xbf16>
    %cst_29 = arith.constant dense<0.000000e+00> : vector<8x32xf32>
    %40 = tpu.matmul %38, %39, %cst_29 {dimension_numbers = #tpu.dot_dimension_numbers<[1], [0], [0], [1], [0, 0, 1, 1], [], []>} : vector<8x32xbf16>, vector<32x32xbf16>, vector<8x32xf32> -> vector<8x32xf32>
    %41 = arith.addf %37, %40 : vector<8x32xf32>
    %cst_30 = arith.constant 0.000000e+00 : f32
    %42 = vector.broadcast %cst_30 : f32 to vector<8x32xf32>
    %43 = arith.maximumf %41, %42 : vector<8x32xf32>
    %44 = arith.truncf %43 : vector<8x32xf32> to vector<8x32xbf16>
    %c0_31 = arith.constant 0 : index
    %c0_32 = arith.constant 0 : index
    %c0_33 = arith.constant 0 : index
    %45 = vector.load %arg4[%c0_31, %c0_32, %c0_33] : memref<1x32x32xbf16, #tpu.memory_space<vmem>>, vector<1x32x32xbf16>
    %46 = vector.shape_cast %45 : vector<1x32x32xbf16> to vector<32x32xbf16>
    %cst_34 = arith.constant dense<0.000000e+00> : vector<8x32xf32>
    %47 = tpu.matmul %44, %46, %cst_34 {dimension_numbers = #tpu.dot_dimension_numbers<[1], [0], [0], [1], [0, 0, 1, 1], [], []>} : vector<8x32xbf16>, vector<32x32xbf16>, vector<8x32xf32> -> vector<8x32xf32>
    %48 = arith.truncf %33 : vector<8x32xf32> to vector<8x32xbf16>
    %c0_35 = arith.constant 0 : index
    %c0_36 = arith.constant 0 : index
    %c0_37 = arith.constant 0 : index
    %49 = vector.load %arg5[%c0_35, %c0_36, %c0_37] : memref<1x32x32xbf16, #tpu.memory_space<vmem>>, vector<1x32x32xbf16>
    %50 = vector.shape_cast %49 : vector<1x32x32xbf16> to vector<32x32xbf16>
    %cst_38 = arith.constant dense<0.000000e+00> : vector<8x32xf32>
    %51 = tpu.matmul %48, %50, %cst_38 {dimension_numbers = #tpu.dot_dimension_numbers<[1], [0], [0], [1], [0, 0, 1, 1], [], []>} : vector<8x32xbf16>, vector<32x32xbf16>, vector<8x32xf32> -> vector<8x32xf32>
    %52 = arith.addf %47, %51 : vector<8x32xf32>
    %53 = vector.broadcast %8 : vector<1x32xf32> to vector<8x32xf32>
    %54 = arith.addf %52, %53 : vector<8x32xf32>
    %cst_39 = arith.constant 0.000000e+00 : f32
    %55 = vector.broadcast %cst_39 : f32 to vector<8x32xf32>
    %56 = arith.maximumf %54, %55 : vector<8x32xf32>
    %c2_i32 = arith.constant 2 : i32
    %c8_i32_40 = arith.constant 8 : i32
    %57 = arith.muli %c2_i32, %c8_i32_40 : i32
    %58 = tpu.assume_multiple %57, 8 : i32
    %59 = arith.index_cast %58 : i32 to index
    %c0_41 = arith.constant 0 : index
    %60 = vector.load %arg10[%59, %c0_41] : memref<64x32xf32, #tpu.memory_space<vmem>>, vector<8x32xf32>
    %61 = arith.truncf %43 : vector<8x32xf32> to vector<8x32xbf16>
    %c0_42 = arith.constant 0 : index
    %c0_43 = arith.constant 0 : index
    %62 = vector.load %arg3[%c0_42, %c0_43] : memref<32x32xbf16, #tpu.memory_space<vmem>>, vector<32x32xbf16>
    %cst_44 = arith.constant dense<0.000000e+00> : vector<8x32xf32>
    %63 = tpu.matmul %61, %62, %cst_44 {dimension_numbers = #tpu.dot_dimension_numbers<[1], [0], [0], [1], [0, 0, 1, 1], [], []>} : vector<8x32xbf16>, vector<32x32xbf16>, vector<8x32xf32> -> vector<8x32xf32>
    %64 = arith.addf %60, %63 : vector<8x32xf32>
    %cst_45 = arith.constant 0.000000e+00 : f32
    %65 = vector.broadcast %cst_45 : f32 to vector<8x32xf32>
    %66 = arith.maximumf %64, %65 : vector<8x32xf32>
    %67 = arith.truncf %66 : vector<8x32xf32> to vector<8x32xbf16>
    %c0_46 = arith.constant 0 : index
    %c0_47 = arith.constant 0 : index
    %c0_48 = arith.constant 0 : index
    %68 = vector.load %arg4[%c0_46, %c0_47, %c0_48] : memref<1x32x32xbf16, #tpu.memory_space<vmem>>, vector<1x32x32xbf16>
    %69 = vector.shape_cast %68 : vector<1x32x32xbf16> to vector<32x32xbf16>
    %cst_49 = arith.constant dense<0.000000e+00> : vector<8x32xf32>
    %70 = tpu.matmul %67, %69, %cst_49 {dimension_numbers = #tpu.dot_dimension_numbers<[1], [0], [0], [1], [0, 0, 1, 1], [], []>} : vector<8x32xbf16>, vector<32x32xbf16>, vector<8x32xf32> -> vector<8x32xf32>
    %71 = arith.truncf %56 : vector<8x32xf32> to vector<8x32xbf16>
    %c0_50 = arith.constant 0 : index
    %c0_51 = arith.constant 0 : index
    %c0_52 = arith.constant 0 : index
    %72 = vector.load %arg5[%c0_50, %c0_51, %c0_52] : memref<1x32x32xbf16, #tpu.memory_space<vmem>>, vector<1x32x32xbf16>
    %73 = vector.shape_cast %72 : vector<1x32x32xbf16> to vector<32x32xbf16>
    %cst_53 = arith.constant dense<0.000000e+00> : vector<8x32xf32>
    %74 = tpu.matmul %71, %73, %cst_53 {dimension_numbers = #tpu.dot_dimension_numbers<[1], [0], [0], [1], [0, 0, 1, 1], [], []>} : vector<8x32xbf16>, vector<32x32xbf16>, vector<8x32xf32> -> vector<8x32xf32>
    %75 = arith.addf %70, %74 : vector<8x32xf32>
    %76 = vector.broadcast %8 : vector<1x32xf32> to vector<8x32xf32>
    %77 = arith.addf %75, %76 : vector<8x32xf32>
    %cst_54 = arith.constant 0.000000e+00 : f32
    %78 = vector.broadcast %cst_54 : f32 to vector<8x32xf32>
    %79 = arith.maximumf %77, %78 : vector<8x32xf32>
    %c3_i32 = arith.constant 3 : i32
    %c8_i32_55 = arith.constant 8 : i32
    %80 = arith.muli %c3_i32, %c8_i32_55 : i32
    %81 = tpu.assume_multiple %80, 8 : i32
    %82 = arith.index_cast %81 : i32 to index
    %c0_56 = arith.constant 0 : index
    %83 = vector.load %arg10[%82, %c0_56] : memref<64x32xf32, #tpu.memory_space<vmem>>, vector<8x32xf32>
    %84 = arith.truncf %66 : vector<8x32xf32> to vector<8x32xbf16>
    %c0_57 = arith.constant 0 : index
    %c0_58 = arith.constant 0 : index
    %85 = vector.load %arg3[%c0_57, %c0_58] : memref<32x32xbf16, #tpu.memory_space<vmem>>, vector<32x32xbf16>
    %cst_59 = arith.constant dense<0.000000e+00> : vector<8x32xf32>
    %86 = tpu.matmul %84, %85, %cst_59 {dimension_numbers = #tpu.dot_dimension_numbers<[1], [0], [0], [1], [0, 0, 1, 1], [], []>} : vector<8x32xbf16>, vector<32x32xbf16>, vector<8x32xf32> -> vector<8x32xf32>
    %87 = arith.addf %83, %86 : vector<8x32xf32>
    %cst_60 = arith.constant 0.000000e+00 : f32
    %88 = vector.broadcast %cst_60 : f32 to vector<8x32xf32>
    %89 = arith.maximumf %87, %88 : vector<8x32xf32>
    %90 = arith.truncf %89 : vector<8x32xf32> to vector<8x32xbf16>
    %c0_61 = arith.constant 0 : index
    %c0_62 = arith.constant 0 : index
    %c0_63 = arith.constant 0 : index
    %91 = vector.load %arg4[%c0_61, %c0_62, %c0_63] : memref<1x32x32xbf16, #tpu.memory_space<vmem>>, vector<1x32x32xbf16>
    %92 = vector.shape_cast %91 : vector<1x32x32xbf16> to vector<32x32xbf16>
    %cst_64 = arith.constant dense<0.000000e+00> : vector<8x32xf32>
    %93 = tpu.matmul %90, %92, %cst_64 {dimension_numbers = #tpu.dot_dimension_numbers<[1], [0], [0], [1], [0, 0, 1, 1], [], []>} : vector<8x32xbf16>, vector<32x32xbf16>, vector<8x32xf32> -> vector<8x32xf32>
    %94 = arith.truncf %79 : vector<8x32xf32> to vector<8x32xbf16>
    %c0_65 = arith.constant 0 : index
    %c0_66 = arith.constant 0 : index
    %c0_67 = arith.constant 0 : index
    %95 = vector.load %arg5[%c0_65, %c0_66, %c0_67] : memref<1x32x32xbf16, #tpu.memory_space<vmem>>, vector<1x32x32xbf16>
    %96 = vector.shape_cast %95 : vector<1x32x32xbf16> to vector<32x32xbf16>
    %cst_68 = arith.constant dense<0.000000e+00> : vector<8x32xf32>
    %97 = tpu.matmul %94, %96, %cst_68 {dimension_numbers = #tpu.dot_dimension_numbers<[1], [0], [0], [1], [0, 0, 1, 1], [], []>} : vector<8x32xbf16>, vector<32x32xbf16>, vector<8x32xf32> -> vector<8x32xf32>
    %98 = arith.addf %93, %97 : vector<8x32xf32>
    %99 = vector.broadcast %8 : vector<1x32xf32> to vector<8x32xf32>
    %100 = arith.addf %98, %99 : vector<8x32xf32>
    %cst_69 = arith.constant 0.000000e+00 : f32
    %101 = vector.broadcast %cst_69 : f32 to vector<8x32xf32>
    %102 = arith.maximumf %100, %101 : vector<8x32xf32>
    %c4_i32 = arith.constant 4 : i32
    %c8_i32_70 = arith.constant 8 : i32
    %103 = arith.muli %c4_i32, %c8_i32_70 : i32
    %104 = tpu.assume_multiple %103, 8 : i32
    %105 = arith.index_cast %104 : i32 to index
    %c0_71 = arith.constant 0 : index
    %106 = vector.load %arg10[%105, %c0_71] : memref<64x32xf32, #tpu.memory_space<vmem>>, vector<8x32xf32>
    %107 = arith.truncf %89 : vector<8x32xf32> to vector<8x32xbf16>
    %c0_72 = arith.constant 0 : index
    %c0_73 = arith.constant 0 : index
    %108 = vector.load %arg3[%c0_72, %c0_73] : memref<32x32xbf16, #tpu.memory_space<vmem>>, vector<32x32xbf16>
    %cst_74 = arith.constant dense<0.000000e+00> : vector<8x32xf32>
    %109 = tpu.matmul %107, %108, %cst_74 {dimension_numbers = #tpu.dot_dimension_numbers<[1], [0], [0], [1], [0, 0, 1, 1], [], []>} : vector<8x32xbf16>, vector<32x32xbf16>, vector<8x32xf32> -> vector<8x32xf32>
    %110 = arith.addf %106, %109 : vector<8x32xf32>
    %cst_75 = arith.constant 0.000000e+00 : f32
    %111 = vector.broadcast %cst_75 : f32 to vector<8x32xf32>
    %112 = arith.maximumf %110, %111 : vector<8x32xf32>
    %113 = arith.truncf %112 : vector<8x32xf32> to vector<8x32xbf16>
    %c0_76 = arith.constant 0 : index
    %c0_77 = arith.constant 0 : index
    %c0_78 = arith.constant 0 : index
    %114 = vector.load %arg4[%c0_76, %c0_77, %c0_78] : memref<1x32x32xbf16, #tpu.memory_space<vmem>>, vector<1x32x32xbf16>
    %115 = vector.shape_cast %114 : vector<1x32x32xbf16> to vector<32x32xbf16>
    %cst_79 = arith.constant dense<0.000000e+00> : vector<8x32xf32>
    %116 = tpu.matmul %113, %115, %cst_79 {dimension_numbers = #tpu.dot_dimension_numbers<[1], [0], [0], [1], [0, 0, 1, 1], [], []>} : vector<8x32xbf16>, vector<32x32xbf16>, vector<8x32xf32> -> vector<8x32xf32>
    %117 = arith.truncf %102 : vector<8x32xf32> to vector<8x32xbf16>
    %c0_80 = arith.constant 0 : index
    %c0_81 = arith.constant 0 : index
    %c0_82 = arith.constant 0 : index
    %118 = vector.load %arg5[%c0_80, %c0_81, %c0_82] : memref<1x32x32xbf16, #tpu.memory_space<vmem>>, vector<1x32x32xbf16>
    %119 = vector.shape_cast %118 : vector<1x32x32xbf16> to vector<32x32xbf16>
    %cst_83 = arith.constant dense<0.000000e+00> : vector<8x32xf32>
    %120 = tpu.matmul %117, %119, %cst_83 {dimension_numbers = #tpu.dot_dimension_numbers<[1], [0], [0], [1], [0, 0, 1, 1], [], []>} : vector<8x32xbf16>, vector<32x32xbf16>, vector<8x32xf32> -> vector<8x32xf32>
    %121 = arith.addf %116, %120 : vector<8x32xf32>
    %122 = vector.broadcast %8 : vector<1x32xf32> to vector<8x32xf32>
    %123 = arith.addf %121, %122 : vector<8x32xf32>
    %cst_84 = arith.constant 0.000000e+00 : f32
    %124 = vector.broadcast %cst_84 : f32 to vector<8x32xf32>
    %125 = arith.maximumf %123, %124 : vector<8x32xf32>
    %c5_i32 = arith.constant 5 : i32
    %c8_i32_85 = arith.constant 8 : i32
    %126 = arith.muli %c5_i32, %c8_i32_85 : i32
    %127 = tpu.assume_multiple %126, 8 : i32
    %128 = arith.index_cast %127 : i32 to index
    %c0_86 = arith.constant 0 : index
    %129 = vector.load %arg10[%128, %c0_86] : memref<64x32xf32, #tpu.memory_space<vmem>>, vector<8x32xf32>
    %130 = arith.truncf %112 : vector<8x32xf32> to vector<8x32xbf16>
    %c0_87 = arith.constant 0 : index
    %c0_88 = arith.constant 0 : index
    %131 = vector.load %arg3[%c0_87, %c0_88] : memref<32x32xbf16, #tpu.memory_space<vmem>>, vector<32x32xbf16>
    %cst_89 = arith.constant dense<0.000000e+00> : vector<8x32xf32>
    %132 = tpu.matmul %130, %131, %cst_89 {dimension_numbers = #tpu.dot_dimension_numbers<[1], [0], [0], [1], [0, 0, 1, 1], [], []>} : vector<8x32xbf16>, vector<32x32xbf16>, vector<8x32xf32> -> vector<8x32xf32>
    %133 = arith.addf %129, %132 : vector<8x32xf32>
    %cst_90 = arith.constant 0.000000e+00 : f32
    %134 = vector.broadcast %cst_90 : f32 to vector<8x32xf32>
    %135 = arith.maximumf %133, %134 : vector<8x32xf32>
    %136 = arith.truncf %135 : vector<8x32xf32> to vector<8x32xbf16>
    %c0_91 = arith.constant 0 : index
    %c0_92 = arith.constant 0 : index
    %c0_93 = arith.constant 0 : index
    %137 = vector.load %arg4[%c0_91, %c0_92, %c0_93] : memref<1x32x32xbf16, #tpu.memory_space<vmem>>, vector<1x32x32xbf16>
    %138 = vector.shape_cast %137 : vector<1x32x32xbf16> to vector<32x32xbf16>
    %cst_94 = arith.constant dense<0.000000e+00> : vector<8x32xf32>
    %139 = tpu.matmul %136, %138, %cst_94 {dimension_numbers = #tpu.dot_dimension_numbers<[1], [0], [0], [1], [0, 0, 1, 1], [], []>} : vector<8x32xbf16>, vector<32x32xbf16>, vector<8x32xf32> -> vector<8x32xf32>
    %140 = arith.truncf %125 : vector<8x32xf32> to vector<8x32xbf16>
    %c0_95 = arith.constant 0 : index
    %c0_96 = arith.constant 0 : index
    %c0_97 = arith.constant 0 : index
    %141 = vector.load %arg5[%c0_95, %c0_96, %c0_97] : memref<1x32x32xbf16, #tpu.memory_space<vmem>>, vector<1x32x32xbf16>
    %142 = vector.shape_cast %141 : vector<1x32x32xbf16> to vector<32x32xbf16>
    %cst_98 = arith.constant dense<0.000000e+00> : vector<8x32xf32>
    %143 = tpu.matmul %140, %142, %cst_98 {dimension_numbers = #tpu.dot_dimension_numbers<[1], [0], [0], [1], [0, 0, 1, 1], [], []>} : vector<8x32xbf16>, vector<32x32xbf16>, vector<8x32xf32> -> vector<8x32xf32>
    %144 = arith.addf %139, %143 : vector<8x32xf32>
    %145 = vector.broadcast %8 : vector<1x32xf32> to vector<8x32xf32>
    %146 = arith.addf %144, %145 : vector<8x32xf32>
    %cst_99 = arith.constant 0.000000e+00 : f32
    %147 = vector.broadcast %cst_99 : f32 to vector<8x32xf32>
    %148 = arith.maximumf %146, %147 : vector<8x32xf32>
    %c6_i32 = arith.constant 6 : i32
    %c8_i32_100 = arith.constant 8 : i32
    %149 = arith.muli %c6_i32, %c8_i32_100 : i32
    %150 = tpu.assume_multiple %149, 8 : i32
    %151 = arith.index_cast %150 : i32 to index
    %c0_101 = arith.constant 0 : index
    %152 = vector.load %arg10[%151, %c0_101] : memref<64x32xf32, #tpu.memory_space<vmem>>, vector<8x32xf32>
    %153 = arith.truncf %135 : vector<8x32xf32> to vector<8x32xbf16>
    %c0_102 = arith.constant 0 : index
    %c0_103 = arith.constant 0 : index
    %154 = vector.load %arg3[%c0_102, %c0_103] : memref<32x32xbf16, #tpu.memory_space<vmem>>, vector<32x32xbf16>
    %cst_104 = arith.constant dense<0.000000e+00> : vector<8x32xf32>
    %155 = tpu.matmul %153, %154, %cst_104 {dimension_numbers = #tpu.dot_dimension_numbers<[1], [0], [0], [1], [0, 0, 1, 1], [], []>} : vector<8x32xbf16>, vector<32x32xbf16>, vector<8x32xf32> -> vector<8x32xf32>
    %156 = arith.addf %152, %155 : vector<8x32xf32>
    %cst_105 = arith.constant 0.000000e+00 : f32
    %157 = vector.broadcast %cst_105 : f32 to vector<8x32xf32>
    %158 = arith.maximumf %156, %157 : vector<8x32xf32>
    %159 = arith.truncf %158 : vector<8x32xf32> to vector<8x32xbf16>
    %c0_106 = arith.constant 0 : index
    %c0_107 = arith.constant 0 : index
    %c0_108 = arith.constant 0 : index
    %160 = vector.load %arg4[%c0_106, %c0_107, %c0_108] : memref<1x32x32xbf16, #tpu.memory_space<vmem>>, vector<1x32x32xbf16>
    %161 = vector.shape_cast %160 : vector<1x32x32xbf16> to vector<32x32xbf16>
    %cst_109 = arith.constant dense<0.000000e+00> : vector<8x32xf32>
    %162 = tpu.matmul %159, %161, %cst_109 {dimension_numbers = #tpu.dot_dimension_numbers<[1], [0], [0], [1], [0, 0, 1, 1], [], []>} : vector<8x32xbf16>, vector<32x32xbf16>, vector<8x32xf32> -> vector<8x32xf32>
    %163 = arith.truncf %148 : vector<8x32xf32> to vector<8x32xbf16>
    %c0_110 = arith.constant 0 : index
    %c0_111 = arith.constant 0 : index
    %c0_112 = arith.constant 0 : index
    %164 = vector.load %arg5[%c0_110, %c0_111, %c0_112] : memref<1x32x32xbf16, #tpu.memory_space<vmem>>, vector<1x32x32xbf16>
    %165 = vector.shape_cast %164 : vector<1x32x32xbf16> to vector<32x32xbf16>
    %cst_113 = arith.constant dense<0.000000e+00> : vector<8x32xf32>
    %166 = tpu.matmul %163, %165, %cst_113 {dimension_numbers = #tpu.dot_dimension_numbers<[1], [0], [0], [1], [0, 0, 1, 1], [], []>} : vector<8x32xbf16>, vector<32x32xbf16>, vector<8x32xf32> -> vector<8x32xf32>
    %167 = arith.addf %162, %166 : vector<8x32xf32>
    %168 = vector.broadcast %8 : vector<1x32xf32> to vector<8x32xf32>
    %169 = arith.addf %167, %168 : vector<8x32xf32>
    %cst_114 = arith.constant 0.000000e+00 : f32
    %170 = vector.broadcast %cst_114 : f32 to vector<8x32xf32>
    %171 = arith.maximumf %169, %170 : vector<8x32xf32>
    %c7_i32 = arith.constant 7 : i32
    %c8_i32_115 = arith.constant 8 : i32
    %172 = arith.muli %c7_i32, %c8_i32_115 : i32
    %173 = tpu.assume_multiple %172, 8 : i32
    %174 = arith.index_cast %173 : i32 to index
    %c0_116 = arith.constant 0 : index
    %175 = vector.load %arg10[%174, %c0_116] : memref<64x32xf32, #tpu.memory_space<vmem>>, vector<8x32xf32>
    %176 = arith.truncf %158 : vector<8x32xf32> to vector<8x32xbf16>
    %c0_117 = arith.constant 0 : index
    %c0_118 = arith.constant 0 : index
    %177 = vector.load %arg3[%c0_117, %c0_118] : memref<32x32xbf16, #tpu.memory_space<vmem>>, vector<32x32xbf16>
    %cst_119 = arith.constant dense<0.000000e+00> : vector<8x32xf32>
    %178 = tpu.matmul %176, %177, %cst_119 {dimension_numbers = #tpu.dot_dimension_numbers<[1], [0], [0], [1], [0, 0, 1, 1], [], []>} : vector<8x32xbf16>, vector<32x32xbf16>, vector<8x32xf32> -> vector<8x32xf32>
    %179 = arith.addf %175, %178 : vector<8x32xf32>
    %cst_120 = arith.constant 0.000000e+00 : f32
    %180 = vector.broadcast %cst_120 : f32 to vector<8x32xf32>
    %181 = arith.maximumf %179, %180 : vector<8x32xf32>
    %182 = arith.truncf %181 : vector<8x32xf32> to vector<8x32xbf16>
    %c0_121 = arith.constant 0 : index
    %c0_122 = arith.constant 0 : index
    %c0_123 = arith.constant 0 : index
    %183 = vector.load %arg4[%c0_121, %c0_122, %c0_123] : memref<1x32x32xbf16, #tpu.memory_space<vmem>>, vector<1x32x32xbf16>
    %184 = vector.shape_cast %183 : vector<1x32x32xbf16> to vector<32x32xbf16>
    %cst_124 = arith.constant dense<0.000000e+00> : vector<8x32xf32>
    %185 = tpu.matmul %182, %184, %cst_124 {dimension_numbers = #tpu.dot_dimension_numbers<[1], [0], [0], [1], [0, 0, 1, 1], [], []>} : vector<8x32xbf16>, vector<32x32xbf16>, vector<8x32xf32> -> vector<8x32xf32>
    %186 = arith.truncf %171 : vector<8x32xf32> to vector<8x32xbf16>
    %c0_125 = arith.constant 0 : index
    %c0_126 = arith.constant 0 : index
    %c0_127 = arith.constant 0 : index
    %187 = vector.load %arg5[%c0_125, %c0_126, %c0_127] : memref<1x32x32xbf16, #tpu.memory_space<vmem>>, vector<1x32x32xbf16>
    %188 = vector.shape_cast %187 : vector<1x32x32xbf16> to vector<32x32xbf16>
    %cst_128 = arith.constant dense<0.000000e+00> : vector<8x32xf32>
    %189 = tpu.matmul %186, %188, %cst_128 {dimension_numbers = #tpu.dot_dimension_numbers<[1], [0], [0], [1], [0, 0, 1, 1], [], []>} : vector<8x32xbf16>, vector<32x32xbf16>, vector<8x32xf32> -> vector<8x32xf32>
    %190 = arith.addf %185, %189 : vector<8x32xf32>
    %191 = vector.broadcast %8 : vector<1x32xf32> to vector<8x32xf32>
    %192 = arith.addf %190, %191 : vector<8x32xf32>
    %cst_129 = arith.constant 0.000000e+00 : f32
    %193 = vector.broadcast %cst_129 : f32 to vector<8x32xf32>
    %194 = arith.maximumf %192, %193 : vector<8x32xf32>
    %c8_i32_130 = arith.constant 8 : i32
    %195 = arith.truncf %194 : vector<8x32xf32> to vector<8x32xbf16>
    %c0_131 = arith.constant 0 : index
    %c0_132 = arith.constant 0 : index
    %196 = vector.load %arg7[%c0_131, %c0_132] : memref<32x128xbf16, #tpu.memory_space<vmem>>, vector<32x128xbf16>
    %cst_133 = arith.constant dense<0.000000e+00> : vector<8x128xf32>
    %197 = tpu.matmul %195, %196, %cst_133 {dimension_numbers = #tpu.dot_dimension_numbers<[1], [0], [0], [1], [0, 0, 1, 1], [], []>} : vector<8x32xbf16>, vector<32x128xbf16>, vector<8x128xf32> -> vector<8x128xf32>
    %c0_134 = arith.constant 0 : index
    %c0_135 = arith.constant 0 : index
    %198 = vector.load %arg8[%c0_134, %c0_135] : memref<1x128xf32, #tpu.memory_space<vmem>>, vector<1x128xf32>
    %199 = vector.broadcast %198 : vector<1x128xf32> to vector<8x128xf32>
    %200 = arith.addf %197, %199 : vector<8x128xf32>
    %c0_136 = arith.constant 0 : index
    %c0_137 = arith.constant 0 : index
    %201 = vector.load %arg9[%c0_136, %c0_137] : memref<8x128xf32, #tpu.memory_space<vmem>>, vector<8x128xf32>
    tpu.vector_store %arg9[%c0_136, %c0_137], %200 {strides = array<i32>} : memref<8x128xf32, #tpu.memory_space<vmem>>, vector<8x128xf32>,
    return
  }
  func.func @transform_0(%arg0: i32) -> (i32, i32, i32) {
    %c0_i32 = arith.constant 0 : i32
    %c0_i32_0 = arith.constant 0 : i32
    %c0_i32_1 = arith.constant 0 : i32
    return %arg0, %c0_i32, %c0_i32_0 : i32, i32, i32
  }
  func.func @transform_1(%arg0: i32) -> (i32, i32) {
    %c0_i32 = arith.constant 0 : i32
    %c0_i32_0 = arith.constant 0 : i32
    %c0_i32_1 = arith.constant 0 : i32
    return %c0_i32, %c0_i32_0 : i32, i32
  }
  func.func @transform_2(%arg0: i32) -> (i32, i32) {
    %c0_i32 = arith.constant 0 : i32
    %c0_i32_0 = arith.constant 0 : i32
    %c0_i32_1 = arith.constant 0 : i32
    return %c0_i32, %c0_i32_0 : i32, i32
  }
  func.func @transform_3(%arg0: i32) -> (i32, i32, i32) {
    %c0_i32 = arith.constant 0 : i32
    %c0_i32_0 = arith.constant 0 : i32
    %c0_i32_1 = arith.constant 0 : i32
    %c0_i32_2 = arith.constant 0 : i32
    return %c0_i32, %c0_i32_0, %c0_i32_1 : i32, i32, i32
  }
  func.func @transform_4(%arg0: i32) -> (i32, i32, i32) {
    %c0_i32 = arith.constant 0 : i32
    %c0_i32_0 = arith.constant 0 : i32
    %c0_i32_1 = arith.constant 0 : i32
    %c0_i32_2 = arith.constant 0 : i32
    return %c0_i32, %c0_i32_0, %c0_i32_1 : i32, i32, i32
  }
  func.func @transform_5(%arg0: i32) -> (i32, i32) {
    %c0_i32 = arith.constant 0 : i32
    %c0_i32_0 = arith.constant 0 : i32
    %c0_i32_1 = arith.constant 0 : i32
    return %c0_i32, %c0_i32_0 : i32, i32
  }
  func.func @transform_6(%arg0: i32) -> (i32, i32) {
    %c0_i32 = arith.constant 0 : i32
    %c0_i32_0 = arith.constant 0 : i32
    %c0_i32_1 = arith.constant 0 : i32
    return %c0_i32, %c0_i32_0 : i32, i32
  }
  func.func @transform_7(%arg0: i32) -> (i32, i32) {
    %c0_i32 = arith.constant 0 : i32
    %c0_i32_0 = arith.constant 0 : i32
    %c0_i32_1 = arith.constant 0 : i32
    return %c0_i32, %c0_i32_0 : i32, i32
  }
  func.func @transform_8(%arg0: i32) -> (i32, i32) {
    %c0_i32 = arith.constant 0 : i32
    %c0_i32_0 = arith.constant 0 : i32
    return %arg0, %c0_i32 : i32, i32
  }
}

</mosaic_0001>

<bundles_post_ra>
// kernel: tpu_custom_call.1
= control target key start
LH: loop header
LB: loop body
LE: loop exit
PB: predicated region body
PF: predicated region fallthrough
CT: control target
= control target key end

     0   :  { %13 = vsyncpa [#allocation4], 0  ;;  %s1070_s0 = inlined_call_operand.vmem [shape: bf16[1,64,16], index: 0, kind: input, shape index: {}]   ;;  %s1071_s1 = inlined_call_operand.vmem [shape: bf16[16,32], index: 1, kind: input, shape index: {}]   ;;  %s1072_s2 = inlined_call_operand.vmem [shape: bf16[32,32], index: 2, kind: input, shape index: {}]   ;;  %s1073_s3 = inlined_call_operand.vmem [shape: bf16[1,32,32], index: 3, kind: input, shape index: {}]   ;;  %s1074_s4 = inlined_call_operand.hbm [shape: bf16[1,32,32], index: 4, kind: input, shape index: {}]   ;;  %s1075_s5 = inlined_call_operand.vmem [shape: f32[2,32], index: 5, kind: input, shape index: {}]   ;;  %s1076_s6 = inlined_call_operand.hbm [shape: bf16[32,128], index: 6, kind: input, shape index: {}]   ;;  %s1077_s7 = inlined_call_operand.vmem [shape: f32[1,128], index: 7, kind: input, shape index: {}]   ;;  %s1078_s8 = inlined_call_operand.hbm [shape: f32[8,128], index: 8, kind: output, shape index: {}]  }
   0x1   :  { %14 = vsyncpa [#allocation7], 0 }
   0x2   :  { %15 = vsyncpa [#allocation5], 0  ;;  %s28_s29 = sshll.u32 %s1074_s4, 4  ;;  %s859_s30 = smov [#allocation3]   ;;  %s29_s29 = int_to_ptr.hbm [resolvable:$true] %s28_s29 }
   0x3   :  { %s30_s9 = sshll.u32 %s859_s30, 4  ;;  %s43_s12 = sshll.u32 %s1076_s6, 4  ;;  %s31_s9 = int_to_ptr.vmem [resolvable:$true] %s30_s9  ;;  %s44_s12 = int_to_ptr.hbm [resolvable:$true] %s43_s12 }
   0x4   :  { %s860_s13 = smov 64   ;;  %s861_s14 = smov 4  }
   0x5   :  { %36 = dma.hbm_to_vmem [thread:$0]  %s29_s29, 256, %s31_s9, [#allocation4], %s860_s13, %s860_s13, %s861_s14  }
   0x6   :  { %s862_s15 = smov [#allocation6]  }
   0x7   :  { %s45_s16 = sshll.u32 %s862_s15, 4  ;;  %s46_s16 = int_to_ptr.vmem [resolvable:$true] %s45_s16 }
   0x8   :  { %51 = dma.hbm_to_vmem [thread:$0]  %s44_s12, 256, %s46_s16, [#allocation7], %s860_s13, %s860_s13, %s861_s14  }
   0x9   :  { %853 = dma.done.wait [#allocation4], 256  }
   0xa   :  { %854 = vsyncadd [#allocation4], 4294967040 }
   0xb   :  { %855 = dma.done.wait [#allocation7], 256  }
   0xc   :  { %856 = vsyncadd [#allocation7], 4294967040  ;;  %v763_v0 = vld [vmem:[%s1071_s1] sm:$0xff]  ;;  %v922_v1 = vld [vmem:[%s1072_s2 + $0x8] sm:$0xff]  ;;  %vm101_vm0 = vcmask 130048   ;;  %v863_v4 = vmov 0  }
   0xd   :  { %v759_v2 = vld [vmem:[%s1070_s0] sm:$0xff]  ;;  %121 = vmatpush.bf16.msra.mxu0 %v763_v0  ;;  %179 = vmatpush.bf16.msra.mxu1 %v922_v1  ;;  %v941_v5 = vld [vmem:[#allocation3 + $0x8] sm:$0xff]  ;;  %vm143_vm1 = vcmask 261120   ;;  %v761_v40 = vld [vmem:[%s1070_s0 + $0x10] sm:$0xff]  ;;  %s864_s12 = smov [#allocation8]   ;;  %s669_s16 = sshll.u32 %s1078_s8, 4  ;;  %s670_s16 = int_to_ptr.hbm [resolvable:$true] %s669_s16 }
   0xe   :  { %v931_v3 = vld [vmem:[%s1072_s2] sm:$0xff]  ;;  %215 = vmatpush.bf16.msra.mxu2 %v941_v5  ;;  %v953_v7 = vld [vmem:[%s1073_s3 + $0x8] sm:$0xff]  ;;  %v762_v46 = vld [vmem:[%s1070_s0 + $0x18] sm:$0xff]  ;;  %s667_s13 = sshll.u32 %s864_s12, 4  ;;  %s668_s13 = int_to_ptr.vmem [resolvable:$true] %s667_s13 }
   0xf   :  { %v945_v6 = vld [vmem:[#allocation3] sm:$0xff]  ;;  %243 = vmatpush.bf16.msra.mxu3 %v953_v7  ;;  %v760_v9 = vld [vmem:[%s1070_s0 + $0x8] sm:$0xff] }
  0x10   :  { %700 = vmatmul.msk.bf16.vlgmr.msra.gmra.mxu0 %vm101_vm0, %v759_v2  ;;  %v960_v8 = vld [vmem:[%s1073_s3] sm:$0xff] }
  0x11   :  { %420 = vmatpush.bf16.msrb.mxu0 %v922_v1  ;;  %180 = vmatpush.bf16.msra.mxu1 %v931_v3  ;;  %v974_v10 = vld [vmem:[%s1075_s5] ss:$0 sm:$0xff]  ;;  %v991_v30 = vld [vmem:[%s1075_s5 + $0x1] ss:$0 sm:$0xff] }
  0x12   :  { %216 = vmatpush.bf16.msra.mxu2 %v945_v6 }
  0x13   :  { %244 = vmatpush.bf16.msra.mxu3 %v960_v8 }
  0x14   :  { %181 = vmatmul.bf16.vlgmr.msra.gmra.mxu1 %v863_v4 }
  0x15   :  { %261 = vmatpush.bf16.msrb.mxu1 %v922_v1  ;;  %421 = vmatpush.bf16.msrb.mxu0 %v931_v3 }
  0x16   :  { %281 = vmatpush.bf16.msrb.mxu2 %v941_v5 }
  0x17   :  { %217 = vmatmul.bf16.vlgmr.msra.gmra.mxu2 %v863_v4  ;;  %297 = vmatpush.bf16.msrb.mxu3 %v953_v7 }
  0x19   :  { %262 = vmatpush.bf16.msrb.mxu1 %v931_v3  ;;  %493 = vmatpush.bf16.msra.mxu0 %v941_v5 }
  0x1a   :  { %282 = vmatpush.bf16.msrb.mxu2 %v945_v6 }
  0x1b   :  { %298 = vmatpush.bf16.msrb.mxu3 %v960_v8 }
  0x1d   :  { %314 = vmatpush.bf16.msra.mxu1 %v922_v1  ;;  %494 = vmatpush.bf16.msra.mxu0 %v945_v6 }
  0x1e   :  { %334 = vmatpush.bf16.msra.mxu2 %v941_v5 }
  0x20   :  { %701 = vmatmul.msk.bf16.gmra.mxu0 %vm101_vm0, %v760_v9 }
  0x21   :  { %315 = vmatpush.bf16.msra.mxu1 %v931_v3 }
  0x22   :  { %335 = vmatpush.bf16.msra.mxu2 %v945_v6 }
  0x30   :  { %702 = vmatmul.msk.bf16.gmra.mxu0 %vm101_vm0, %v761_v40 }
  0x40   :  { %703 = vmatmul.msk.bf16.gmra.mxu0 %vm101_vm0, %v762_v46 }
  0x8d   :  { %v123_v11 = vpop.f32.mrf.mxu0 }
  0x8e   :  { %v124_v12 = vadd.f32 %v974_v10, %v123_v11 }
  0x90   :  { %144 = vst.msk [vmem:[#allocation2] sm:$0xff] %vm143_vm1, %v124_v12 }
  0x91   :  { %v182_v13 = vpop.f32.mrf.mxu1 }
  0x95   :  { %v125_v14 = vpop.f32.mrf.mxu0 }
  0x96   :  { %v126_v15 = vadd.f32 %v974_v10, %v125_v14 }
  0x97   :  { %v153_v16 = vld [vmem:[#allocation2] sm:$0xff] }
  0x98   :  { %v186_v17 = vadd.f32 %v182_v13, %v153_v16  ;;  %145 = vst.msk [vmem:[#allocation2 + $0x8] sm:$0xff] %vm143_vm1, %v126_v15 }
  0x99   :  { %v184_v18 = vpop.f32.mrf.mxu1 }
  0x9a   :  { %v187_v19 = vmax.f32 %v186_v17, 0.0  ;;  %v218_v21 = vpop.f32.mrf.mxu2 }
  0x9c   :  { %v188_v20 = vpack.c.bf16 %v187_v19, %v187_v19 }
  0x9d   :  { %v128_v23 = vpop.f32.mrf.mxu0 }
  0x9e   :  { %728 = vmatmul.msk.bf16.vlgmr.msra.gmra.mxu3 %vm143_vm1, %v188_v20  ;;  %729 = vmatmul.msk.bf16.vlgmr.msrb.gmra.mxu1 %vm143_vm1, %v188_v20  ;;  %v129_v24 = vadd.f32 %v974_v10, %v128_v23 }
  0x9f   :  { %350 = vmatpush.bf16.msra.mxu3 %v953_v7  ;;  %367 = vmatpush.bf16.msrb.mxu1 %v922_v1  ;;  %v254_v25 = vld [vmem:[#allocation2 + $0x8] sm:$0xff] }
  0xa0   :  { %146 = vst.msk [vmem:[#allocation2 + $0x10] sm:$0xff] %vm143_vm1, %v129_v24 }
  0xa2   :  { %v220_v22 = vpop.f32.mrf.mxu2 }
  0xa3   :  { %351 = vmatpush.bf16.msra.mxu3 %v960_v8  ;;  %368 = vmatpush.bf16.msrb.mxu1 %v931_v3 }
  0xa5   :  { %v130_v38 = vpop.f32.mrf.mxu0 }
  0xa6   :  { %v131_v39 = vadd.f32 %v974_v10, %v130_v38 }
  0xa7   :  { %v307_v41 = vld [vmem:[#allocation2 + $0x10] sm:$0xff] }
  0xa8   :  { %147 = vst.msk [vmem:[#allocation2 + $0x18] sm:$0xff] %vm143_vm1, %v131_v39 }
  0xad   :  { %v133_v56 = vpop.f32.mrf.mxu0 }
  0xae   :  { %v134_v59 = vadd.f32 %v974_v10, %v133_v56 }
  0xaf   :  { %v360_v57 = vld [vmem:[#allocation2 + $0x18] sm:$0xff] }
  0xb0   :  { %148 = vst.msk [vmem:[#allocation2 + $0x20] sm:$0xff] %vm143_vm1, %v134_v59 }
  0xb5   :  { %v135_v0 = vpop.f32.mrf.mxu0 }
  0xb6   :  { %v136_v4 = vadd.f32 %v974_v10, %v135_v0 }
  0xb8   :  { %149 = vst.msk [vmem:[#allocation2 + $0x28] sm:$0xff] %vm143_vm1, %v136_v4 }
  0xbd   :  { %v138_v11 = vpop.f32.mrf.mxu0 }
  0xbe   :  { %v139_v12 = vadd.f32 %v974_v10, %v138_v11 }
  0xc0   :  { %150 = vst.msk [vmem:[#allocation2 + $0x30] sm:$0xff] %vm143_vm1, %v139_v12 }
  0xc5   :  { %v140_v15 = vpop.f32.mrf.mxu0 }
  0xc6   :  { %v141_v16 = vadd.f32 %v974_v10, %v140_v15 }
  0xc8   :  { %151 = vst.msk [vmem:[#allocation2 + $0x38] sm:$0xff] %vm143_vm1, %v141_v16  ;;  %v770_v16 = vld [vmem:[#allocation6] sm:$0xff] }
 0x11b   :  { %v264_v26 = vpop.f32.mrf.mxu1 }
 0x11c   :  { %v268_v27 = vadd.f32 %v264_v26, %v254_v25 }
 0x11e   :  { %v269_v28 = vmax.f32 %v268_v27, 0.0 }
 0x120   :  { %v270_v29 = vpack.c.bf16 %v269_v28, %v269_v28 }
 0x121   :  { %v246_v31 = vpop.f32.mrf.mxu3 }
 0x122   :  { %v247_v32 = vadd.f32 %v246_v31, %v218_v21  ;;  %731 = vmatmul.msk.bf16.vlgmr.msrb.gmra.mxu3 %vm143_vm1, %v270_v29  ;;  %732 = vmatmul.msk.bf16.vlgmr.msra.gmra.mxu1 %vm143_vm1, %v270_v29  ;;  %v413_v21 = vld [vmem:[#allocation2 + $0x20] sm:$0xff] }
 0x123   :  { %v266_v33 = vpop.f32.mrf.mxu1  ;;  %403 = vmatpush.bf16.msrb.mxu3 %v953_v7  ;;  %440 = vmatpush.bf16.msra.mxu1 %v941_v5 }
 0x124   :  { %v251_v34 = vadd.f32 %v991_v30, %v247_v32 }
 0x126   :  { %v252_v35 = vmax.f32 %v251_v34, 0.0 }
 0x127   :  { %404 = vmatpush.bf16.msrb.mxu3 %v960_v8  ;;  %441 = vmatpush.bf16.msra.mxu1 %v945_v6 }
 0x128   :  { %v271_v36 = vpack.c.bf16 %v252_v35, %v252_v35 }
 0x129   :  { %v248_v37 = vpop.f32.mrf.mxu3 }
 0x12a   :  { %730 = vmatmul.msk.bf16.vlgmr.msrb.gmra.mxu2 %vm143_vm1, %v271_v36 }
 0x12b   :  { %387 = vmatpush.bf16.msrb.mxu2 %v941_v5 }
 0x12f   :  { %388 = vmatpush.bf16.msrb.mxu2 %v945_v6 }
 0x19f   :  { %v317_v42 = vpop.f32.mrf.mxu1 }
 0x1a0   :  { %v321_v43 = vadd.f32 %v317_v42, %v307_v41 }
 0x1a2   :  { %v322_v44 = vmax.f32 %v321_v43, 0.0 }
 0x1a4   :  { %v323_v45 = vpack.c.bf16 %v322_v44, %v322_v44  ;;  %v519_v44 = vld [vmem:[#allocation2 + $0x30] sm:$0xff] }
 0x1a5   :  { %v300_v47 = vpop.f32.mrf.mxu3 }
 0x1a6   :  { %734 = vmatmul.msk.bf16.vlgmr.msra.gmra.mxu3 %vm143_vm1, %v323_v45  ;;  %735 = vmatmul.msk.bf16.vlgmr.msrb.gmra.mxu1 %vm143_vm1, %v323_v45 }
 0x1a7   :  { %v319_v48 = vpop.f32.mrf.mxu1  ;;  %473 = vmatpush.bf16.msra.mxu3 %v922_v1  ;;  %509 = vmatpush.bf16.msrb.mxu1 %v953_v7 }
 0x1ab   :  { %474 = vmatpush.bf16.msra.mxu3 %v931_v3  ;;  %510 = vmatpush.bf16.msrb.mxu1 %v960_v8 }
 0x1ad   :  { %v284_v49 = vpop.f32.mrf.mxu2  ;;  %v302_v50 = vpop.f32.mrf.mxu3 }
 0x1ae   :  { %v301_v51 = vadd.f32 %v300_v47, %v284_v49 }
 0x1b0   :  { %v304_v52 = vadd.f32 %v991_v30, %v301_v51 }
 0x1b2   :  { %v305_v53 = vmax.f32 %v304_v52, 0.0 }
 0x1b4   :  { %v324_v54 = vpack.c.bf16 %v305_v53, %v305_v53 }
 0x1b5   :  { %v286_v55 = vpop.f32.mrf.mxu2 }
 0x1b6   :  { %733 = vmatmul.msk.bf16.vlgmr.msra.gmra.mxu2 %vm143_vm1, %v324_v54 }
 0x1b7   :  { %456 = vmatpush.bf16.msra.mxu2 %v953_v7 }
 0x1bb   :  { %457 = vmatpush.bf16.msra.mxu2 %v960_v8 }
 0x223   :  { %v370_v58 = vpop.f32.mrf.mxu1 }
 0x224   :  { %v374_v60 = vadd.f32 %v370_v58, %v360_v57  ;;  %v572_v58 = vld [vmem:[#allocation2 + $0x38] sm:$0xff] }
 0x226   :  { %v375_v61 = vmax.f32 %v374_v60, 0.0 }
 0x228   :  { %v376_v62 = vpack.c.bf16 %v375_v61, %v375_v61 }
 0x229   :  { %v353_v63 = vpop.f32.mrf.mxu3 }
 0x22a   :  { %737 = vmatmul.msk.bf16.vlgmr.msrb.gmra.mxu3 %vm143_vm1, %v376_v62  ;;  %738 = vmatmul.msk.bf16.vlgmr.msrb.gmra.mxu0 %vm143_vm1, %v376_v62 }
 0x22b   :  { %v372_v2 = vpop.f32.mrf.mxu1  ;;  %562 = vmatpush.bf16.msrb.mxu0 %v953_v7  ;;  %546 = vmatpush.bf16.msrb.mxu3 %v941_v5 }
 0x22f   :  { %563 = vmatpush.bf16.msrb.mxu0 %v960_v8  ;;  %547 = vmatpush.bf16.msrb.mxu3 %v945_v6 }
 0x231   :  { %v355_v9 = vpop.f32.mrf.mxu3 }
 0x239   :  { %v337_v13 = vpop.f32.mrf.mxu2 }
 0x23a   :  { %v354_v14 = vadd.f32 %v353_v63, %v337_v13 }
 0x23c   :  { %v357_v17 = vadd.f32 %v991_v30, %v354_v14  ;;  %v771_v14 = vld [vmem:[#allocation6 + $0x8] sm:$0xff] }
 0x23e   :  { %v358_v18 = vmax.f32 %v357_v17, 0.0 }
 0x240   :  { %v377_v19 = vpack.c.bf16 %v358_v18, %v358_v18 }
 0x241   :  { %v339_v20 = vpop.f32.mrf.mxu2 }
 0x242   :  { %736 = vmatmul.msk.bf16.vlgmr.msrb.gmra.mxu2 %vm143_vm1, %v377_v19 }
 0x243   :  { %526 = vmatpush.bf16.msrb.mxu2 %v922_v1 }
 0x247   :  { %527 = vmatpush.bf16.msrb.mxu2 %v931_v3 }
 0x2a7   :  { %v423_v22 = vpop.f32.mrf.mxu0 }
 0x2a8   :  { %v427_v23 = vadd.f32 %v423_v22, %v413_v21 }
 0x2aa   :  { %v428_v24 = vmax.f32 %v427_v23, 0.0 }
 0x2ac   :  { %v429_v25 = vpack.c.bf16 %v428_v24, %v428_v24  ;;  %v780_v24 = vld [vmem:[%s1077_s7] ss:$0 sm:$0xff] }
 0x2ad   :  { %v406_v26 = vpop.f32.mrf.mxu3 }
 0x2ae   :  { %740 = vmatmul.msk.bf16.vlgmr.msra.gmra.mxu2 %vm143_vm1, %v429_v25  ;;  %741 = vmatmul.msk.bf16.vlgmr.msra.gmra.mxu3 %vm143_vm1, %v429_v25 }
 0x2af   :  { %v425_v10 = vpop.f32.mrf.mxu0  ;;  %615 = vmatpush.bf16.msra.mxu3 %v953_v7  ;;  %599 = vmatpush.bf16.msra.mxu2 %v941_v5  ;;  %v466_v5 = vld [vmem:[#allocation2 + $0x28] sm:$0xff] }
 0x2b3   :  { %616 = vmatpush.bf16.msra.mxu3 %v960_v8  ;;  %600 = vmatpush.bf16.msra.mxu2 %v945_v6 }
 0x2b5   :  { %v408_v27 = vpop.f32.mrf.mxu3 }
 0x2c5   :  { %v390_v28 = vpop.f32.mrf.mxu2 }
 0x2c6   :  { %v407_v29 = vadd.f32 %v406_v26, %v390_v28 }
 0x2c8   :  { %v410_v31 = vadd.f32 %v991_v30, %v407_v29 }
 0x2ca   :  { %v411_v32 = vmax.f32 %v410_v31, 0.0 }
 0x2cc   :  { %v430_v33 = vpack.c.bf16 %v411_v32, %v411_v32 }
 0x2cd   :  { %v392_v34 = vpop.f32.mrf.mxu2 }
 0x2ce   :  { %739 = vmatmul.msk.bf16.vlgmr.msra.gmra.mxu1 %vm143_vm1, %v430_v33 }
 0x2cf   :  { %579 = vmatpush.bf16.msra.mxu1 %v922_v1 }
 0x2d3   :  { %580 = vmatpush.bf16.msra.mxu1 %v931_v3 }
 0x331   :  { %v459_v7 = vpop.f32.mrf.mxu2  ;;  %v476_v35 = vpop.f32.mrf.mxu3 }
 0x332   :  { %v480_v8 = vadd.f32 %v476_v35, %v466_v5 }
 0x334   :  { %v481_v36 = vmax.f32 %v480_v8, 0.0 }
 0x336   :  { %v482_v6 = vpack.c.bf16 %v481_v36, %v481_v36 }
 0x338   :  { %743 = vmatmul.msk.bf16.vlgmr.msrb.gmra.mxu1 %vm143_vm1, %v482_v6  ;;  %744 = vmatmul.msk.bf16.vlgmr.msrb.gmra.mxu2 %vm143_vm1, %v482_v6 }
 0x339   :  { %v461_v37 = vpop.f32.mrf.mxu2  ;;  %v478_v38 = vpop.f32.mrf.mxu3 }
 0x34b   :  { %v443_v39 = vpop.f32.mrf.mxu1 }
 0x34c   :  { %v460_v40 = vadd.f32 %v459_v7, %v443_v39 }
 0x34e   :  { %v463_v41 = vadd.f32 %v991_v30, %v460_v40 }
 0x350   :  { %v464_v42 = vmax.f32 %v463_v41, 0.0 }
 0x352   :  { %v483_v1 = vpack.c.bf16 %v464_v42, %v464_v42 }
 0x353   :  { %v445_v43 = vpop.f32.mrf.mxu1 }
 0x354   :  { %742 = vmatmul.msk.bf16.vlgmr.msra.gmra.mxu0 %vm143_vm1, %v483_v1 }
 0x355   :  { %654 = vmatpush.bf16.msra.mxu0 %v771_v14 }
 0x359   :  { %655 = vmatpush.bf16.msra.mxu0 %v770_v16 }
 0x3b5   :  { %v512_v3 = vpop.f32.mrf.mxu1 }
 0x3bb   :  { %v529_v45 = vpop.f32.mrf.mxu2 }
 0x3bc   :  { %v533_v46 = vadd.f32 %v529_v45, %v519_v44 }
 0x3bd   :  { %v514_v47 = vpop.f32.mrf.mxu1 }
 0x3be   :  { %v534_v48 = vmax.f32 %v533_v46, 0.0 }
 0x3c0   :  { %v535_v49 = vpack.c.bf16 %v534_v48, %v534_v48 }
 0x3c2   :  { %746 = vmatmul.msk.bf16.vlgmr.msrb.gmra.mxu0 %vm143_vm1, %v535_v49  ;;  %747 = vmatmul.msk.bf16.vlgmr.msra.gmra.mxu1 %vm143_vm1, %v535_v49 }
 0x3c3   :  { %v531_v50 = vpop.f32.mrf.mxu2 }
 0x3d1   :  { %v496_v51 = vpop.f32.mrf.mxu0 }
 0x3d2   :  { %v513_v52 = vadd.f32 %v512_v3, %v496_v51 }
 0x3d4   :  { %v516_v53 = vadd.f32 %v991_v30, %v513_v52 }
 0x3d6   :  { %v517_v54 = vmax.f32 %v516_v53, 0.0 }
 0x3d8   :  { %v536_v55 = vpack.c.bf16 %v517_v54, %v517_v54 }
 0x3d9   :  { %v498_v56 = vpop.f32.mrf.mxu0 }
 0x3da   :  { %745 = vmatmul.msk.bf16.vlgmr.msrb.gmra.mxu3 %vm143_vm1, %v536_v55 }
 0x43f   :  { %v565_v57 = vpop.f32.mrf.mxu0  ;;  %v582_v59 = vpop.f32.mrf.mxu1 }
 0x440   :  { %v586_v60 = vadd.f32 %v582_v59, %v572_v58 }
 0x442   :  { %v587_v61 = vmax.f32 %v586_v60, 0.0 }
 0x444   :  { %v588_v62 = vpack.c.bf16 %v587_v61, %v587_v61 }
 0x446   :  { %749 = vmatmul.msk.bf16.vlgmr.msra.gmra.mxu3 %vm143_vm1, %v588_v62 }
 0x447   :  { %v567_v63 = vpop.f32.mrf.mxu0  ;;  %v584_v0 = vpop.f32.mrf.mxu1 }
 0x45d   :  { %v549_v2 = vpop.f32.mrf.mxu3 }
 0x45e   :  { %v566_v4 = vadd.f32 %v565_v57, %v549_v2 }
 0x460   :  { %v569_v9 = vadd.f32 %v991_v30, %v566_v4 }
 0x462   :  { %v570_v11 = vmax.f32 %v569_v9, 0.0 }
 0x464   :  { %v589_v12 = vpack.c.bf16 %v570_v11, %v570_v11 }
 0x465   :  { %v551_v13 = vpop.f32.mrf.mxu3 }
 0x466   :  { %748 = vmatmul.msk.bf16.vlgmr.msra.gmra.mxu2 %vm143_vm1, %v589_v12 }
 0x4c9   :  { %v618_v15 = vpop.f32.mrf.mxu3 }
 0x4d1   :  { %v620_v17 = vpop.f32.mrf.mxu3 }
 0x4e9   :  { %v602_v18 = vpop.f32.mrf.mxu2 }
 0x4ea   :  { %v619_v19 = vadd.f32 %v618_v15, %v602_v18 }
 0x4ec   :  { %v622_v20 = vadd.f32 %v991_v30, %v619_v19 }
 0x4ee   :  { %v623_v21 = vmax.f32 %v622_v20, 0.0 }
 0x4f0   :  { %v624_v22 = vpack.c.bf16 %v623_v21, %v623_v21 }
 0x4f1   :  { %v604_v23 = vpop.f32.mrf.mxu2 }
 0x4f2   :  { %758 = vmatmul.msk.bf16.vlgmr.msra.gmra.mxu0 %vm143_vm1, %v624_v22 }
 0x56f   :  { %v657_v25 = vpop.f32.mrf.mxu0 }
 0x570   :  { %v658_v26 = vadd.f32 %v780_v24, %v657_v25 }
 0x572   :  { %661 = vst [vmem:[#allocation8] sm:$0xff] %v658_v26 }
 0x573   :  { %672 = dma.vmem_to_hbm [thread:$0]  %s668_s13, 128, %s670_s16, [#allocation5]  }
 0x577   :  { %v659_v30 = vpop.f32.mrf.mxu0 }
 0x578   :  { %857 = dma.done.wait [#allocation5], 128  }
 0x579   :  { %858 = vsyncadd [#allocation5], 4294967168 }
 0x57a   :  { %677 = vsyncpa [#allocation4], 1 }
 0x57b   :  { %678 = vsyncpa [#allocation7], 1 }
 0x57c   :  { %679 = vsyncpa [#allocation5], 1 }

</bundles_post_ra>
